<compile_context>
chip_gen: v7x
topology: tpu7x:2x2x1
jax: 0.10.0
libtpu: 0.0.40
codegen_flags: <defaults>
</compile_context>

<pallas_src>
import jax
import jax.numpy as jnp
from jax.experimental import pallas as pl
from jax.experimental.pallas import tpu as pltpu


def _round_up(n, m):
    return ((n + m - 1) // m) * m


# --------------------------------------------------------------------------- #
# Kernel
# --------------------------------------------------------------------------- #
def _head_kernel(x_ref, w_ref, scale_ref, b_ref, o_ref):
    # x_ref:     (TB, F)  caller dtype (cast to compute dtype in-kernel)
    # w_ref:     (F, Cp)  compute dtype (bf16/f32), pre-transposed weight_norm 'v'
    # scale_ref: (1, Cp)  f32  precomputed g / ||v||_row   (hoisted out of kernel)
    # b_ref:     (1, Cp)  f32  bias
    # o_ref:     (TB, Cp) caller dtype
    x = x_ref[...].astype(w_ref.dtype)                       # in-kernel operand cast
    y = jax.lax.dot_general(                                  # MXU, f32 accumulation
        x, w_ref[...],
        dimension_numbers=(((1,), (0,)), ((), ())),           # canonical (M,K)x(K,N)
        preferred_element_type=jnp.float32,
    )
    # post-scale by g/||v|| and add bias on the (TB, Cp) output (O(B*C) VALU work)
    o_ref[...] = (y * scale_ref[...] + b_ref[...]).astype(o_ref.dtype)


# --------------------------------------------------------------------------- #
# One-time weight preparation (hoist out of the per-call path in real use)
# --------------------------------------------------------------------------- #
def prepare_head_weights(v, g, b, compute_dtype=jnp.bfloat16):
    """Returns (w_t (F, C_pad) compute_dtype, scale (1, C_pad) f32,
    bias (1, C_pad) f32, num_classes)."""
    C, F = v.shape
    C_pad = _round_up(C, 128)                                 # lane-dense class dim
    v32 = v.astype(jnp.float32)
    # per-output-row L2 norm (weight_norm dim=0 for Linear); no eps, matches PyTorch
    norm = jnp.sqrt(jnp.sum(v32 * v32, axis=1))               # (C,)
    scale = g.astype(jnp.float32) / norm                      # (C,)
    bias = b.astype(jnp.float32)

    w_t = jnp.transpose(v32).astype(compute_dtype)            # (F, C) in matmul dtype
    if C_pad != C:
        pad = C_pad - C
        w_t = jnp.pad(w_t, ((0, 0), (0, pad)))                # zero columns
        scale = jnp.pad(scale, (0, pad))                      # zero scale -> zero output
        bias = jnp.pad(bias, (0, pad))
    return w_t, scale.reshape(1, C_pad), bias.reshape(1, C_pad), C


# --------------------------------------------------------------------------- #
# Forward with prepped weights
# --------------------------------------------------------------------------- #
def _derive_tile_b(B, F, C_pad, x_bytes, w_bytes, out_bytes, budget_bytes):
    # double-buffered resident weight + scale/bias (fixed) ; per-batch-row cost is
    # double-buffered x tile + double-buffered output tile.
    fixed = 2 * (F * C_pad * w_bytes + 2 * C_pad * 4)
    per_row = 2 * (F * x_bytes + C_pad * out_bytes)
    avail = budget_bytes - fixed
    cap = avail // per_row if avail > 0 else 8
    cap = max(8, (cap // 8) * 8)
    cap = min(cap, 2048)                                      # amortize ~0.35us/step
    return min(cap, _round_up(B, 8))


def base_head_visda_apply(x, w_t, scale, bias, num_classes, *, tile_b=None,
                          vmem_budget_bytes=24 * 1024 * 1024):
    B, F = x.shape
    Fw, C_pad = w_t.shape
    assert F == Fw, "in_features mismatch between x and prepped weight"
    out_dtype = x.dtype

    x_bytes = jnp.dtype(x.dtype).itemsize
    w_bytes = jnp.dtype(w_t.dtype).itemsize
    o_bytes = jnp.dtype(out_dtype).itemsize

    if tile_b is None:
        tile_b = _derive_tile_b(B, F, C_pad, x_bytes, w_bytes, o_bytes,
                                vmem_budget_bytes)
    else:
        tile_b = max(8, _round_up(tile_b, 8))

    grid_b = pl.cdiv(B, tile_b)                               # ragged last block OK

    cost = pl.CostEstimate(
        flops=2 * grid_b * tile_b * C_pad * F,
        transcendentals=0,                                    # scale precomputed
        bytes_accessed=(B * F * x_bytes                       # x
                        + F * C_pad * w_bytes                 # resident weight
                        + 2 * C_pad * 4                       # scale, bias
                        + B * C_pad * o_bytes),               # output
    )

    out = pl.pallas_call(
        _head_kernel,
        out_shape=jax.ShapeDtypeStruct((B, C_pad), out_dtype),
        grid=(grid_b,),
        in_specs=[
            pl.BlockSpec((tile_b, F), lambda i: (i, 0)),
            pl.BlockSpec((F, C_pad), lambda i: (0, 0)),       # constant index -> resident
            pl.BlockSpec((1, C_pad), lambda i: (0, 0)),
            pl.BlockSpec((1, C_pad), lambda i: (0, 0)),
        ],
        out_specs=pl.BlockSpec((tile_b, C_pad), lambda i: (i, 0)),
        compiler_params=pltpu.CompilerParams(
            dimension_semantics=("parallel",),                # megacore / v7x 2-TC
            vmem_limit_bytes=48 * 1024 * 1024,                # > v5e 16MiB default, < v7x 64MiB
        ),
        cost_estimate=cost,
    )(x, w_t, scale, bias)

    return out[:, :num_classes]                               # drop class padding


# --------------------------------------------------------------------------- #
# Convenience: raw (v, g, b) -> forward.  In real training/inference code call
# prepare_head_weights() ONCE and reuse the result across steps.
# --------------------------------------------------------------------------- #
def base_head_visda(x, v, g, b, *, compute_dtype=jnp.bfloat16, tile_b=None,
                    vmem_budget_bytes=24 * 1024 * 1024):
    w_t, scale, bias, C = prepare_head_weights(v, g, b, compute_dtype)
    return base_head_visda_apply(x, w_t, scale, bias, C, tile_b=tile_b,
                                 vmem_budget_bytes=vmem_budget_bytes)


def _reference(x, v, g, b):
    norm = jnp.sqrt(jnp.sum(v * v, axis=1, keepdims=True))
    w = g[:, None] * v / norm
    return x @ w.T + b[None, :]


if __name__ == "__main__":
    key = jax.random.PRNGKey(0)
    k_x, k_v, k_x2 = jax.random.split(key, 3)

    batch = 8
    in_features = 32
    num_classes = 12   # VisDA-C style head

    # Deterministic synthetic parameters (xavier-ish v; bias = 0 per init_weights;
    # g initialized to the per-row norm of v, as weight_norm does at construction).
    x = jax.random.normal(k_x, (batch, in_features), dtype=jnp.float32)
    v = jax.random.normal(k_v, (num_classes, in_features), dtype=jnp.float32) * (
        1.0 / jnp.sqrt(jnp.float32(in_features))
    )
    g = jnp.sqrt(jnp.sum(v * v, axis=1))
    b = jnp.zeros((num_classes,), dtype=jnp.float32)

    y_ref = _reference(x, v, g, b)

    # Default path: bf16 matmul operands, f32 accumulation -> loose tolerance.
    y = jax.block_until_ready(base_head_visda(x, v, g, b))
    assert y.shape == (batch, num_classes)
    assert y.dtype == x.dtype
    assert jnp.allclose(y, y_ref, atol=5e-2, rtol=5e-2), "mismatch (bf16 path)"

    # Full-f32 path of the same kernel must match tightly.
    y32 = jax.block_until_ready(base_head_visda(x, v, g, b, compute_dtype=jnp.float32))
    assert jnp.allclose(y32, y_ref, atol=1e-4, rtol=1e-4), "mismatch (f32 path)"

    # Ragged batch (B not a multiple of the 8-row tile granularity): exercises
    # the no-concat, masked-last-block path.
    x2 = jax.random.normal(k_x2, (13, in_features), dtype=jnp.float32)
    y2 = jax.block_until_ready(base_head_visda(x2, v, g, b, compute_dtype=jnp.float32))
    assert y2.shape == (13, num_classes)
    assert jnp.allclose(y2, _reference(x2, v, g, b), atol=1e-4, rtol=1e-4), "mismatch (ragged)"

    print("KERNEL_OK")
</pallas_src>

<mosaic_0001>
module attributes {stable_mosaic.version = 11 : i64} {
  func.func @_head_kernel(%arg0: i32, %arg1: memref<8x32xf32, #tpu.memory_space<vmem>>, %arg2: memref<32x128xbf16, #tpu.memory_space<vmem>>, %arg3: memref<1x128xf32, #tpu.memory_space<vmem>>, %arg4: memref<1x128xf32, #tpu.memory_space<vmem>>, %arg5: memref<8x128xf32, #tpu.memory_space<vmem>>) attributes {dimension_semantics = [#tpu.dimension_semantics<parallel>], iteration_bounds = array<i64: 1>, scalar_prefetch = 0 : i64, scratch_operands = 0 : i64, tpu.core_type = #tpu.core_type<tc>, window_params = [{transform_indices = @transform_0, window_bounds = array<i64: 8, 32>}, {pipeline_mode = #tpu.pipeline_mode<synchronous>, transform_indices = @transform_1, window_bounds = array<i64: 32, 128>}, {pipeline_mode = #tpu.pipeline_mode<synchronous>, transform_indices = @transform_2, window_bounds = array<i64: 1, 128>}, {pipeline_mode = #tpu.pipeline_mode<synchronous>, transform_indices = @transform_3, window_bounds = array<i64: 1, 128>}, {transform_indices = @transform_4, window_bounds = array<i64: 8, 128>}]} {
    %c0 = arith.constant 0 : index
    %c0_0 = arith.constant 0 : index
    %0 = vector.load %arg1[%c0, %c0_0] : memref<8x32xf32, #tpu.memory_space<vmem>>, vector<8x32xf32>
    %1 = arith.truncf %0 : vector<8x32xf32> to vector<8x32xbf16>
    %c0_1 = arith.constant 0 : index
    %c0_2 = arith.constant 0 : index
    %2 = vector.load %arg2[%c0_1, %c0_2] : memref<32x128xbf16, #tpu.memory_space<vmem>>, vector<32x128xbf16>
    %cst = arith.constant dense<0.000000e+00> : vector<8x128xf32>
    %3 = tpu.matmul %1, %2, %cst {dimension_numbers = #tpu.dot_dimension_numbers<[1], [0], [0], [1], [0, 0, 1, 1], [], []>} : vector<8x32xbf16>, vector<32x128xbf16>, vector<8x128xf32> -> vector<8x128xf32>
    %c0_3 = arith.constant 0 : index
    %c0_4 = arith.constant 0 : index
    %4 = vector.load %arg3[%c0_3, %c0_4] : memref<1x128xf32, #tpu.memory_space<vmem>>, vector<1x128xf32>
    %5 = vector.broadcast %4 : vector<1x128xf32> to vector<8x128xf32>
    %6 = arith.mulf %3, %5 : vector<8x128xf32>
    %c0_5 = arith.constant 0 : index
    %c0_6 = arith.constant 0 : index
    %7 = vector.load %arg4[%c0_5, %c0_6] : memref<1x128xf32, #tpu.memory_space<vmem>>, vector<1x128xf32>
    %8 = vector.broadcast %7 : vector<1x128xf32> to vector<8x128xf32>
    %9 = arith.addf %6, %8 : vector<8x128xf32>
    %c0_7 = arith.constant 0 : index
    %c0_8 = arith.constant 0 : index
    %10 = vector.load %arg5[%c0_7, %c0_8] : memref<8x128xf32, #tpu.memory_space<vmem>>, vector<8x128xf32>
    tpu.vector_store %arg5[%c0_7, %c0_8], %9 {strides = array<i32>} : memref<8x128xf32, #tpu.memory_space<vmem>>, vector<8x128xf32>,
    return
  }
  func.func @transform_0(%arg0: i32) -> (i32, i32) {
    %c0_i32 = arith.constant 0 : i32
    %c0_i32_0 = arith.constant 0 : i32
    return %arg0, %c0_i32 : i32, i32
  }
  func.func @transform_1(%arg0: i32) -> (i32, i32) {
    %c0_i32 = arith.constant 0 : i32
    %c0_i32_0 = arith.constant 0 : i32
    %c0_i32_1 = arith.constant 0 : i32
    return %c0_i32, %c0_i32_0 : i32, i32
  }
  func.func @transform_2(%arg0: i32) -> (i32, i32) {
    %c0_i32 = arith.constant 0 : i32
    %c0_i32_0 = arith.constant 0 : i32
    %c0_i32_1 = arith.constant 0 : i32
    return %c0_i32, %c0_i32_0 : i32, i32
  }
  func.func @transform_3(%arg0: i32) -> (i32, i32) {
    %c0_i32 = arith.constant 0 : i32
    %c0_i32_0 = arith.constant 0 : i32
    %c0_i32_1 = arith.constant 0 : i32
    return %c0_i32, %c0_i32_0 : i32, i32
  }
  func.func @transform_4(%arg0: i32) -> (i32, i32) {
    %c0_i32 = arith.constant 0 : i32
    %c0_i32_0 = arith.constant 0 : i32
    return %arg0, %c0_i32 : i32, i32
  }
}

</mosaic_0001>

<bundles_post_ra>
// kernel: tpu_custom_call.1
= control target key start
LH: loop header
LB: loop body
LE: loop exit
PB: predicated region body
PF: predicated region fallthrough
CT: control target
= control target key end

     0   :  { %9 = vsyncpa [#allocation3], 0  ;;  %s318_s0 = inlined_call_operand.hbm [shape: f32[8,32], index: 0, kind: input, shape index: {}]   ;;  %s319_s1 = inlined_call_operand.hbm [shape: bf16[32,128], index: 1, kind: input, shape index: {}]   ;;  %s320_s2 = inlined_call_operand.vmem [shape: f32[1,128], index: 2, kind: input, shape index: {}]   ;;  %s321_s3 = inlined_call_operand.vmem [shape: f32[1,128], index: 3, kind: input, shape index: {}]   ;;  %s322_s4 = inlined_call_operand.hbm [shape: f32[8,128], index: 4, kind: output, shape index: {}]  }
   0x1   :  { %10 = vsyncpa [#allocation6], 0 }
   0x2   :  { %11 = vsyncpa [#allocation4], 0  ;;  %s237_s15 = smov [#allocation2]   ;;  %s238_s17 = smov [#allocation5]  }
   0x3   :  { %s18_s16 = sshll.u32 %s237_s15, 4  ;;  %s27_s18 = sshll.u32 %s238_s17, 4  ;;  %s19_s16 = int_to_ptr.vmem [resolvable:$true] %s18_s16  ;;  %s269_s18 = int_to_ptr.vmem [resolvable:$true] %s27_s18 }
   0x4   :  { %s165_s21 = scalar_lea.hbm %s318_s0, 128 }
   0x5   :  { %p166_p0 = scmp.ne.s32.totalorder %s318_s0, %s165_s21  ;;  %p169_p1 = scmp.lt.u32.totalorder %s165_s21, %s318_s0 }
   0x7   :  { %p171_p2 = pnand %p169_p1, %p166_p0 }
   0x9   :  { %174 = shalt.err (!%p171_p2)
}
   0xa   :  { %s175_s26 = scalar_lea.vmem %s19_s16, 128  ;;  %p180_p4 = scmp.lt.s32.totalorder %s19_s16, %s19_s16 }
   0xb   :  { %p176_p3 = scmp.ne.s32.totalorder %s19_s16, %s175_s26  ;;  %p181_p5 = scmp.lt.s32.totalorder %s175_s26, %s175_s26 }
   0xd   :  { %p182_p6 = por %p181_p5, %p180_p4 }
   0xf   :  { %p183_p7 = pnand %p182_p6, %p176_p3 }
  0x11   :  { %186 = shalt.err (!%p183_p7)
}
  0x12   :  { %21 = dma.hbm_to_vmem [thread:$0]  %s318_s0, 128, %s19_s16, [#allocation3]  }
  0x13   :  { %s187_s5 = scalar_lea.hbm %s319_s1, 256 }
  0x14   :  { %p188_p8 = scmp.ne.s32.totalorder %s319_s1, %s187_s5  ;;  %p191_p9 = scmp.lt.u32.totalorder %s187_s5, %s319_s1 }
  0x16   :  { %p193_p10 = pnand %p191_p9, %p188_p8 }
  0x18   :  { %196 = shalt.err (!%p193_p10)
}
  0x19   :  { %s197_s10 = scalar_lea.vmem %s269_s18, 256  ;;  %p202_p12 = scmp.lt.s32.totalorder %s269_s18, %s269_s18 }
  0x1a   :  { %p198_p11 = scmp.ne.s32.totalorder %s269_s18, %s197_s10  ;;  %p203_p13 = scmp.lt.s32.totalorder %s197_s10, %s197_s10 }
  0x1c   :  { %p204_p0 = por %p203_p13, %p202_p12 }
  0x1e   :  { %p205_p1 = pnand %p204_p0, %p198_p11 }
  0x20   :  { %208 = shalt.err (!%p205_p1)
}
  0x21   :  { %s239_s0 = smov 64   ;;  %s240_s11 = smov 4  }
  0x22   :  { %33 = dma.hbm_to_vmem [thread:$0]  %s319_s1, 256, %s269_s18, [#allocation6], %s239_s0, %s239_s0, %s240_s11  }
  0x23   :  { %231 = dma.done.wait [#allocation3], 128  }
  0x24   :  { %232 = vsyncadd [#allocation3], 4294967168 }
  0x25   :  { %233 = dma.done.wait [#allocation6], 256  }
  0x26   :  { %234 = vsyncadd [#allocation6], 4294967040  ;;  %v241_v0 = vmov 0.0   ;;  %vm242_vm0 = vmmov 0   ;;  %v163_v1 = vld [vmem:[#allocation5] sm:$0xff]   ;;  %v164_v2 = vld [vmem:[#allocation5 + $0x8] sm:$0xff]  }
  0x27   :  { %148 = vmatprep.subr.bf16.mxu0 %v241_v0  ;;  %152 = vmatprep.mubr.msk.bf16.mxu0 %vm242_vm0, %v241_v0  ;;  %v45_v3 = vld [vmem:[#allocation2] sm:$0xff]  ;;  %vm63_vm1 = vcmask 261120   ;;  %s243_s17 = smov [#allocation7]  }
  0x28   :  { %149 = vmatpush3.bf16.msra.mxu0 %v163_v1  ;;  %v46_v4 = vpack.c.bf16 %v45_v3, %v45_v3  ;;  %v143_v5 = vld [vmem:[%s320_s2] ss:$0 sm:$0xff]  ;;  %s130_s18 = sshll.u32 %s243_s17, 4  ;;  %s131_s18 = int_to_ptr.vmem [resolvable:$true] %s130_s18 }
  0x29   :  { %150 = vmatprep.subr.bf16.mxu0 %v241_v0  ;;  %v144_v7 = vld [vmem:[%s321_s3] ss:$0 sm:$0xff]  ;;  %s209_s19 = scalar_lea.vmem %s131_s18, 128  ;;  %p214_p3 = scmp.lt.s32.totalorder %s131_s18, %s131_s18 }
  0x2a   :  { %p210_p2 = scmp.ne.s32.totalorder %s131_s18, %s209_s19  ;;  %p215_p4 = scmp.lt.s32.totalorder %s209_s19, %s209_s19 }
  0x2c   :  { %151 = vmatpush3.bf16.msra.mxu0 %v164_v2  ;;  %p216_p5 = por %p215_p4, %p214_p3 }
  0x2e   :  { %p217_p6 = pnand %p216_p5, %p210_p2 }
  0x2f   :  { %153 = vmatmul.mubr.msk.bf16.vlgmr.msra.gmra.mrb[0].mxu0 %vm63_vm1, %v46_v4 }
 0x102   :  { %v101_v6 = vpop.f32.mrb[0].mxu0 }
 0x103   :  { %v114_v8 = vmul.f32 %v143_v5, %v101_v6  ;;  %v154_v9 = vpop.f32.mrb[1].mxu0 }
 0x104   :  { %v104_v10 = vpop.f32.mrb[2].mxu0 }
 0x105   :  { %v122_v11 = vadd.f32 %v144_v7, %v114_v8  ;;  %v155_v12 = vpop.f32.mrb[3].mxu0 }
 0x107   :  { %123 = vst [vmem:[#allocation7] sm:$0xff] %v122_v11 }
 0x108   :  { %220 = shalt.err (!%p217_p6)
}
 0x109   :  { %s221_s3 = scalar_lea.hbm %s322_s4, 128 }
 0x10a   :  { %p222_p7 = scmp.ne.s32.totalorder %s322_s4, %s221_s3  ;;  %p225_p8 = scmp.lt.u32.totalorder %s221_s3, %s322_s4 }
 0x10c   :  { %p227_p9 = pnand %p225_p8, %p222_p7 }
 0x10e   :  { %230 = shalt.err (!%p227_p9)
}
 0x10f   :  { %133 = dma.vmem_to_hbm [thread:$0]  %s131_s18, 128, %s322_s4, [#allocation4]  }
 0x110   :  { %235 = dma.done.wait [#allocation4], 128  }
 0x111   :  { %236 = vsyncadd [#allocation4], 4294967168 }
 0x112   :  { %137 = vsyncpa [#allocation3], 1 }
 0x113   :  { %138 = vsyncpa [#allocation6], 1 }
 0x114   :  { %139 = vsyncpa [#allocation4], 1 }

</bundles_post_ra>
